<compile_context>
chip_gen: v6e
topology: v6e:2x2x1
jax: 0.10.0
libtpu: 0.0.40
codegen_flags: <defaults>
</compile_context>

<pallas_src>
import jax
import jax.numpy as jnp
from jax.experimental import pallas as pl
from jax.experimental.pallas import tpu as pltpu


def _round_up(x: int, m: int) -> int:
    return (x + m - 1) // m * m


def _sigmoid(v):
    # EUP-friendly sigmoid: exp + approx reciprocal (both EUP slot), no VPU div.
    return pl.reciprocal(1.0 + jnp.exp(-v), approx=True)


def mlp_kernel(x_ref, w1_ref, b1_ref, w2_ref, b2_ref, o_ref):
    # First linear: bf16 operands -> MXU, f32 accumulate; f32 epilogue.
    h = jnp.dot(x_ref[...], w1_ref[...], preferred_element_type=jnp.float32)
    h = _sigmoid(h + b1_ref[...])                      # b1 is (1, H), f32
    # Second linear: cast activation to the weight (bf16) dtype for the MXU.
    y = jnp.dot(h.astype(w2_ref.dtype), w2_ref[...],
                preferred_element_type=jnp.float32)
    o_ref[...] = _sigmoid(y + b2_ref[...]).astype(o_ref.dtype)


def prepare_params(w1, b1, w2, b2, *, matmul_dtype=jnp.bfloat16):
    """One-time param prep (call at init, NOT per forward).

    w1: (D_in, H), b1: (1, H), w2: (H, D_out), b2: (1, D_out) — f32, stored
    transposed vs. torch.nn.Linear so the kernel does y = x @ W + b.

    Only D_out is padded (to 128, lane-dense output store); padding is exact
    (padded output columns are sliced off in net_forward).  Matmul operands are
    cast to bf16 here; biases stay f32 for the f32 epilogue.
    """
    H, D_out = w2.shape
    D_out_p = _round_up(D_out, 128)
    w2p = jnp.zeros((H, D_out_p), jnp.float32).at[:, :D_out].set(w2)
    b2p = jnp.zeros((1, D_out_p), jnp.float32).at[:, :D_out].set(b2)
    return {
        "w1": w1.astype(matmul_dtype),       # (D_in, H)
        "b1": b1.astype(jnp.float32),        # (1, H)
        "w2": w2p.astype(matmul_dtype),      # (H, D_out_p)
        "b2": b2p,                           # (1, D_out_p), f32
        "d_out": int(D_out),
    }


def net_forward(x, params, *, block_b=512):
    """x: (B, D_in) f32.  Returns sigmoid(sigmoid(x@w1+b1)@w2+b2), (B, D_out) f32."""
    B, D_in = x.shape
    w1, b1, w2, b2 = params["w1"], params["b1"], params["w2"], params["b2"]
    D_out = params["d_out"]
    H = w1.shape[1]
    D_out_p = w2.shape[1]

    # Balanced, 8-aligned batch tiles.  B <= block_b -> single grid step
    # (best for single-TC v5e/v6e); larger B -> near-equal tiles so v7x's two
    # TensorCores stay balanced under dimension_semantics=("parallel",).
    n_blocks = max(1, -(-B // block_b))
    TB = _round_up(-(-B // n_blocks), 8)
    B_p = _round_up(B, TB)
    grid = (B_p // TB,)

    # Cast to bf16 BEFORE padding; pad only the batch dim, only if needed.
    xb = x.astype(w1.dtype)
    if B_p != B:
        xb = jnp.zeros((B_p, D_in), xb.dtype).at[:B].set(xb)

    resident = dict(pipeline_mode=pl.Buffered(1))   # constant index -> 1 buffer

    out_p = pl.pallas_call(
        mlp_kernel,
        out_shape=jax.ShapeDtypeStruct((B_p, D_out_p), jnp.float32),
        grid=grid,
        in_specs=[
            pl.BlockSpec((TB, D_in), lambda i: (i, 0)),                 # x tile
            pl.BlockSpec((D_in, H), lambda i: (0, 0), **resident),      # w1
            pl.BlockSpec((1, H), lambda i: (0, 0), **resident),         # b1
            pl.BlockSpec((H, D_out_p), lambda i: (0, 0), **resident),   # w2
            pl.BlockSpec((1, D_out_p), lambda i: (0, 0), **resident),   # b2
        ],
        out_specs=pl.BlockSpec((TB, D_out_p), lambda i: (i, 0)),
        compiler_params=pltpu.CompilerParams(
            dimension_semantics=("parallel",)),
    )(xb, w1, b1, w2, b2)

    # TODO(synk): skip this slice when the caller can consume the padded slab.
    return out_p[:B, :D_out]


if __name__ == "__main__":
    # Shapes implied by Net(D_in, H, D_out); B not 8-aligned to exercise the
    # batch-padding path (collapses to a single 304-row grid step).
    B, D_in, H, D_out = 300, 32, 64, 16

    key = jax.random.PRNGKey(0)
    kx, kw1, kb1, kw2, kb2 = jax.random.split(key, 5)

    x = jax.random.normal(kx, (B, D_in), dtype=jnp.float32)

    # Deterministic param init (PyTorch Linear stores weight as (out, in);
    # we store the transpose (in, out) for direct x @ W).
    bound1 = 1.0 / jnp.sqrt(D_in)
    w1 = jax.random.uniform(kw1, (D_in, H), minval=-bound1, maxval=bound1,
                            dtype=jnp.float32)
    b1 = jax.random.uniform(kb1, (1, H), minval=-bound1, maxval=bound1,
                            dtype=jnp.float32)
    bound2 = 1.0 / jnp.sqrt(H)
    w2 = jax.random.uniform(kw2, (H, D_out), minval=-bound2, maxval=bound2,
                            dtype=jnp.float32)
    b2 = jax.random.uniform(kb2, (1, D_out), minval=-bound2, maxval=bound2,
                            dtype=jnp.float32)

    params = prepare_params(w1, b1, w2, b2)          # one-time pad/cast
    out = net_forward(x, params)
    out = jax.block_until_ready(out)
    assert out.shape == (B, D_out)

    # Reference 1: same bf16-operand / f32-accumulate math (exact sigmoid);
    # tolerance covers the approx-reciprocal sigmoid in the kernel.
    bf16 = jnp.bfloat16
    ref_h = jax.nn.sigmoid(
        jnp.dot(x.astype(bf16), w1.astype(bf16),
                preferred_element_type=jnp.float32) + b1)
    ref = jax.nn.sigmoid(
        jnp.dot(ref_h.astype(bf16), w2.astype(bf16),
                preferred_element_type=jnp.float32) + b2)
    assert jnp.allclose(out, ref, atol=1e-2, rtol=1e-2), \
        float(jnp.max(jnp.abs(out - ref)))

    # Reference 2: full-f32 math, loose tolerance (bf16 operand rounding).
    ref_f32 = jax.nn.sigmoid(jax.nn.sigmoid(x @ w1 + b1) @ w2 + b2)
    assert jnp.allclose(out, ref_f32, atol=2e-2, rtol=2e-2), \
        float(jnp.max(jnp.abs(out - ref_f32)))

    print("KERNEL_OK")
</pallas_src>

<mosaic_0001>
module attributes {stable_mosaic.version = 11 : i64} {
  func.func @mlp_kernel(%arg0: i32, %arg1: memref<304x32xbf16, #tpu.memory_space<vmem>>, %arg2: memref<32x64xbf16, #tpu.memory_space<vmem>>, %arg3: memref<1x64xf32, #tpu.memory_space<vmem>>, %arg4: memref<64x128xbf16, #tpu.memory_space<vmem>>, %arg5: memref<1x128xf32, #tpu.memory_space<vmem>>, %arg6: memref<304x128xf32, #tpu.memory_space<vmem>>) attributes {dimension_semantics = [#tpu.dimension_semantics<parallel>], iteration_bounds = array<i64: 1>, scalar_prefetch = 0 : i64, scratch_operands = 0 : i64, tpu.core_type = #tpu.core_type<tc>, window_params = [{transform_indices = @transform_0, window_bounds = array<i64: 304, 32>}, {pipeline_mode = #tpu.pipeline_mode<synchronous>, transform_indices = @transform_1, window_bounds = array<i64: 32, 64>}, {pipeline_mode = #tpu.pipeline_mode<synchronous>, transform_indices = @transform_2, window_bounds = array<i64: 1, 64>}, {pipeline_mode = #tpu.pipeline_mode<synchronous>, transform_indices = @transform_3, window_bounds = array<i64: 64, 128>}, {pipeline_mode = #tpu.pipeline_mode<synchronous>, transform_indices = @transform_4, window_bounds = array<i64: 1, 128>}, {transform_indices = @transform_5, window_bounds = array<i64: 304, 128>}]} {
    %c0 = arith.constant 0 : index
    %c0_0 = arith.constant 0 : index
    %0 = vector.load %arg1[%c0, %c0_0] : memref<304x32xbf16, #tpu.memory_space<vmem>>, vector<304x32xbf16>
    %c0_1 = arith.constant 0 : index
    %c0_2 = arith.constant 0 : index
    %1 = vector.load %arg2[%c0_1, %c0_2] : memref<32x64xbf16, #tpu.memory_space<vmem>>, vector<32x64xbf16>
    %cst = arith.constant dense<0.000000e+00> : vector<304x64xf32>
    %2 = tpu.matmul %0, %1, %cst {dimension_numbers = #tpu.dot_dimension_numbers<[1], [0], [0], [1], [0, 0, 1, 1], [], []>} : vector<304x32xbf16>, vector<32x64xbf16>, vector<304x64xf32> -> vector<304x64xf32>
    %c0_3 = arith.constant 0 : index
    %c0_4 = arith.constant 0 : index
    %3 = vector.load %arg3[%c0_3, %c0_4] : memref<1x64xf32, #tpu.memory_space<vmem>>, vector<1x64xf32>
    %4 = vector.broadcast %3 : vector<1x64xf32> to vector<304x64xf32>
    %5 = arith.addf %2, %4 : vector<304x64xf32>
    %cst_5 = arith.constant 0.000000e+00 : f32
    %6 = vector.broadcast %cst_5 : f32 to vector<304x64xf32>
    %7 = arith.subf %6, %5 : vector<304x64xf32>
    %8 = math.exp %7 : vector<304x64xf32>
    %cst_6 = arith.constant 1.000000e+00 : f32
    %9 = vector.broadcast %cst_6 : f32 to vector<304x64xf32>
    %10 = arith.addf %9, %8 : vector<304x64xf32>
    %11 = tpu.reciprocal %10 {approx = true} : vector<304x64xf32> -> vector<304x64xf32>
    %12 = arith.truncf %11 : vector<304x64xf32> to vector<304x64xbf16>
    %c0_7 = arith.constant 0 : index
    %c0_8 = arith.constant 0 : index
    %13 = vector.load %arg4[%c0_7, %c0_8] : memref<64x128xbf16, #tpu.memory_space<vmem>>, vector<64x128xbf16>
    %cst_9 = arith.constant dense<0.000000e+00> : vector<304x128xf32>
    %14 = tpu.matmul %12, %13, %cst_9 {dimension_numbers = #tpu.dot_dimension_numbers<[1], [0], [0], [1], [0, 0, 1, 1], [], []>} : vector<304x64xbf16>, vector<64x128xbf16>, vector<304x128xf32> -> vector<304x128xf32>
    %c0_10 = arith.constant 0 : index
    %c0_11 = arith.constant 0 : index
    %15 = vector.load %arg5[%c0_10, %c0_11] : memref<1x128xf32, #tpu.memory_space<vmem>>, vector<1x128xf32>
    %16 = vector.broadcast %15 : vector<1x128xf32> to vector<304x128xf32>
    %17 = arith.addf %14, %16 : vector<304x128xf32>
    %cst_12 = arith.constant 0.000000e+00 : f32
    %18 = vector.broadcast %cst_12 : f32 to vector<304x128xf32>
    %19 = arith.subf %18, %17 : vector<304x128xf32>
    %20 = math.exp %19 : vector<304x128xf32>
    %cst_13 = arith.constant 1.000000e+00 : f32
    %21 = vector.broadcast %cst_13 : f32 to vector<304x128xf32>
    %22 = arith.addf %21, %20 : vector<304x128xf32>
    %23 = tpu.reciprocal %22 {approx = true} : vector<304x128xf32> -> vector<304x128xf32>
    %c0_14 = arith.constant 0 : index
    %c0_15 = arith.constant 0 : index
    %24 = vector.load %arg6[%c0_14, %c0_15] : memref<304x128xf32, #tpu.memory_space<vmem>>, vector<304x128xf32>
    tpu.vector_store %arg6[%c0_14, %c0_15], %23 {strides = array<i32>} : memref<304x128xf32, #tpu.memory_space<vmem>>, vector<304x128xf32>,
    return
  }
  func.func @transform_0(%arg0: i32) -> (i32, i32) {
    %c0_i32 = arith.constant 0 : i32
    %c0_i32_0 = arith.constant 0 : i32
    return %arg0, %c0_i32 : i32, i32
  }
  func.func @transform_1(%arg0: i32) -> (i32, i32) {
    %c0_i32 = arith.constant 0 : i32
    %c0_i32_0 = arith.constant 0 : i32
    %c0_i32_1 = arith.constant 0 : i32
    return %c0_i32, %c0_i32_0 : i32, i32
  }
  func.func @transform_2(%arg0: i32) -> (i32, i32) {
    %c0_i32 = arith.constant 0 : i32
    %c0_i32_0 = arith.constant 0 : i32
    %c0_i32_1 = arith.constant 0 : i32
    return %c0_i32, %c0_i32_0 : i32, i32
  }
  func.func @transform_3(%arg0: i32) -> (i32, i32) {
    %c0_i32 = arith.constant 0 : i32
    %c0_i32_0 = arith.constant 0 : i32
    %c0_i32_1 = arith.constant 0 : i32
    return %c0_i32, %c0_i32_0 : i32, i32
  }
  func.func @transform_4(%arg0: i32) -> (i32, i32) {
    %c0_i32 = arith.constant 0 : i32
    %c0_i32_0 = arith.constant 0 : i32
    %c0_i32_1 = arith.constant 0 : i32
    return %c0_i32, %c0_i32_0 : i32, i32
  }
  func.func @transform_5(%arg0: i32) -> (i32, i32) {
    %c0_i32 = arith.constant 0 : i32
    %c0_i32_0 = arith.constant 0 : i32
    return %arg0, %c0_i32 : i32, i32
  }
}

</mosaic_0001>

<bundles_post_ra>
// kernel: tpu_custom_call.1
= control target key start
LH: loop header
LB: loop body
LE: loop exit
PB: predicated region body
PF: predicated region fallthrough
CT: control target
= control target key end

     0   :  { %v1785_v1 = vmov 0.0   ;;  %vm1786_vm0 = vmmov 0   ;;  %vm178_vm1 = vcmask 261120   ;;  %s2104_s0 = inlined_call_operand.vmem [shape: bf16[304,32], index: 0, kind: input, shape index: {}]   ;;  %s2105_s1 = inlined_call_operand.vmem [shape: bf16[32,64], index: 1, kind: input, shape index: {}]   ;;  %s2106_s2 = inlined_call_operand.vmem [shape: f32[1,64], index: 2, kind: input, shape index: {}]   ;;  %s2107_s3 = inlined_call_operand.vmem [shape: bf16[64,128], index: 3, kind: input, shape index: {}]   ;;  %s2108_s4 = inlined_call_operand.vmem [shape: f32[1,128], index: 4, kind: input, shape index: {}]   ;;  %s2109_s5 = inlined_call_operand.hbm [shape: f32[304,128], index: 5, kind: output, shape index: {}]  }
   0x1   :  { %v1434_v0 = vld [vmem:[%s2105_s1 + $0x8] sm:$0xff]   ;;  %1265 = vmatprep.subr.bf16.mxu0 %v1785_v1  ;;  %1345 = vmatprep.subr.bf16.mxu1 %v1785_v1  ;;  %v1435_v2 = vld [vmem:[%s2105_s1] sm:$0xff]   ;;  %v1438_v5 = vld [vmem:[%s2104_s0 + $0x10] sm:$0xff]  }
   0x2   :  { %1266 = vmatpush3.bf16.msra.mxu0 %v1434_v0  ;;  %1269 = vmatprep.mubr.msk.bf16.mxu0 %vm1786_vm0, %v1785_v1  ;;  %v1436_v3 = vld [vmem:[%s2104_s0] sm:$0xff]   ;;  %v1437_v4 = vld [vmem:[%s2104_s0 + $0x8] sm:$0xff]  }
   0x3   :  { %1267 = vmatprep.subr.bf16.mxu0 %v1785_v1  ;;  %1353 = vmatprep.mubr.msk.bf16.mxu1 %vm1786_vm0, %v1785_v1 }
   0x6   :  { %1268 = vmatpush3.bf16.msra.mxu0 %v1435_v2 }
   0x9   :  { %1270 = vmatmul.mubr.msk.bf16.vlgmr.msra.gmra.mxu0 %vm178_vm1, %v1436_v3 }
   0xa   :  { %1273 = vmatprep.mubr.msk.bf16.mxu0 %vm1786_vm0, %v1785_v1 }
  0x11   :  { %1274 = vmatmul.mubr.msk.bf16.gmra.mxu0 %vm178_vm1, %v1437_v4 }
  0x12   :  { %1277 = vmatprep.mubr.msk.bf16.mxu0 %vm1786_vm0, %v1785_v1 }
  0x13   :  { %10 = vsyncpa [#allocation3], 0  ;;  %v1439_v6 = vld [vmem:[%s2104_s0 + $0x18] sm:$0xff]   ;;  %v1440_v7 = vld [vmem:[%s2104_s0 + $0x20] sm:$0xff]   ;;  %vm669_vm2 = vcmask 523264  }
  0x14   :  { %v1441_v8 = vld [vmem:[%s2104_s0 + $0x28] sm:$0xff]   ;;  %v1442_v9 = vld [vmem:[%s2104_s0 + $0x30] sm:$0xff]   ;;  %v1443_v10 = vld [vmem:[%s2104_s0 + $0x38] sm:$0xff]  }
  0x15   :  { %v1444_v11 = vld [vmem:[%s2104_s0 + $0x40] sm:$0xff]   ;;  %v1445_v12 = vld [vmem:[%s2104_s0 + $0x48] sm:$0xff]   ;;  %v1446_v13 = vld [vmem:[%s2104_s0 + $0x50] sm:$0xff]  }
  0x16   :  { %v1447_v14 = vld [vmem:[%s2104_s0 + $0x58] sm:$0xff]   ;;  %v1448_v16 = vld [vmem:[%s2104_s0 + $0x60] sm:$0xff]   ;;  %v1456_v17 = vld [vmem:[%s2107_s3 + $0x10] sm:$0xff]  }
  0x17   :  { %v1455_v15 = vld [vmem:[%s2107_s3 + $0x18] sm:$0xff]   ;;  %v1457_v18 = vld [vmem:[%s2107_s3 + $0x8] sm:$0xff]   ;;  %v1458_v20 = vld [vmem:[%s2107_s3] sm:$0xff]  }
  0x18   :  { %1346 = vmatpush3.bf16.msra.mxu1 %v1455_v15  ;;  %v1449_v19 = vld [vmem:[%s2104_s0 + $0x68] sm:$0xff]   ;;  %v1450_v21 = vld [vmem:[%s2104_s0 + $0x70] sm:$0xff]   ;;  %v1451_v22 = vld [vmem:[%s2104_s0 + $0x78] sm:$0xff]  }
  0x19   :  { %1278 = vmatmul.mubr.msk.bf16.gmra.mxu0 %vm178_vm1, %v1438_v5  ;;  %1347 = vmatprep.subr.bf16.mxu1 %v1785_v1  ;;  %v1452_v23 = vld [vmem:[%s2104_s0 + $0x80] sm:$0xff]   ;;  %v1453_v24 = vld [vmem:[%s2104_s0 + $0x88] sm:$0xff]   ;;  %v1454_v25 = vld [vmem:[%s2104_s0 + $0x90] sm:$0xff]  }
  0x1a   :  { %1281 = vmatprep.mubr.msk.bf16.mxu0 %vm1786_vm0, %v1785_v1  ;;  %v1963_v26 = vld [vmem:[%s2106_s2] ss:$0 sm:$0xff] }
  0x1c   :  { %1348 = vmatpush3.bf16.msra.mxu1 %v1456_v17 }
  0x1d   :  { %1349 = vmatprep.subr.bf16.mxu1 %v1785_v1 }
  0x20   :  { %1350 = vmatpush3.bf16.msra.mxu1 %v1457_v18 }
  0x21   :  { %1282 = vmatmul.mubr.msk.bf16.gmra.mxu0 %vm178_vm1, %v1439_v6  ;;  %1351 = vmatprep.subr.bf16.mxu1 %v1785_v1 }
  0x22   :  { %1285 = vmatprep.mubr.msk.bf16.mxu0 %vm1786_vm0, %v1785_v1 }
  0x24   :  { %1352 = vmatpush3.bf16.msra.mxu1 %v1458_v20 }
  0x29   :  { %1286 = vmatmul.mubr.msk.bf16.gmra.mxu0 %vm178_vm1, %v1440_v7 }
  0x2a   :  { %1289 = vmatprep.mubr.msk.bf16.mxu0 %vm1786_vm0, %v1785_v1 }
  0x31   :  { %1290 = vmatmul.mubr.msk.bf16.gmra.mxu0 %vm178_vm1, %v1441_v8 }
  0x32   :  { %1293 = vmatprep.mubr.msk.bf16.mxu0 %vm1786_vm0, %v1785_v1 }
  0x39   :  { %1294 = vmatmul.mubr.msk.bf16.gmra.mxu0 %vm178_vm1, %v1442_v9 }
  0x3a   :  { %1297 = vmatprep.mubr.msk.bf16.mxu0 %vm1786_vm0, %v1785_v1 }
  0x41   :  { %1298 = vmatmul.mubr.msk.bf16.gmra.mxu0 %vm178_vm1, %v1443_v10 }
  0x42   :  { %1301 = vmatprep.mubr.msk.bf16.mxu0 %vm1786_vm0, %v1785_v1 }
  0x49   :  { %1302 = vmatmul.mubr.msk.bf16.gmra.mxu0 %vm178_vm1, %v1444_v11 }
  0x4a   :  { %1305 = vmatprep.mubr.msk.bf16.mxu0 %vm1786_vm0, %v1785_v1 }
  0x51   :  { %1306 = vmatmul.mubr.msk.bf16.gmra.mxu0 %vm178_vm1, %v1445_v12 }
  0x52   :  { %1309 = vmatprep.mubr.msk.bf16.mxu0 %vm1786_vm0, %v1785_v1 }
  0x59   :  { %1310 = vmatmul.mubr.msk.bf16.gmra.mxu0 %vm178_vm1, %v1446_v13 }
  0x5a   :  { %1313 = vmatprep.mubr.msk.bf16.mxu0 %vm1786_vm0, %v1785_v1 }
  0x61   :  { %1314 = vmatmul.mubr.msk.bf16.gmra.mxu0 %vm178_vm1, %v1447_v14 }
  0x62   :  { %1317 = vmatprep.mubr.msk.bf16.mxu0 %vm1786_vm0, %v1785_v1 }
  0x69   :  { %1318 = vmatmul.mubr.msk.bf16.gmra.mxu0 %vm178_vm1, %v1448_v16 }
  0x6a   :  { %1321 = vmatprep.mubr.msk.bf16.mxu0 %vm1786_vm0, %v1785_v1 }
  0x71   :  { %1322 = vmatmul.mubr.msk.bf16.gmra.mxu0 %vm178_vm1, %v1449_v19 }
  0x72   :  { %1325 = vmatprep.mubr.msk.bf16.mxu0 %vm1786_vm0, %v1785_v1 }
  0x79   :  { %1326 = vmatmul.mubr.msk.bf16.gmra.mxu0 %vm178_vm1, %v1450_v21 }
  0x7a   :  { %1329 = vmatprep.mubr.msk.bf16.mxu0 %vm1786_vm0, %v1785_v1 }
  0x81   :  { %1330 = vmatmul.mubr.msk.bf16.gmra.mxu0 %vm178_vm1, %v1451_v22 }
  0x82   :  { %1333 = vmatprep.mubr.msk.bf16.mxu0 %vm1786_vm0, %v1785_v1 }
  0x89   :  { %1334 = vmatmul.mubr.msk.bf16.gmra.mxu0 %vm178_vm1, %v1452_v23 }
  0x8a   :  { %1337 = vmatprep.mubr.msk.bf16.mxu0 %vm1786_vm0, %v1785_v1 }
  0x91   :  { %1338 = vmatmul.mubr.msk.bf16.gmra.mxu0 %vm178_vm1, %v1453_v24 }
  0x92   :  { %1341 = vmatprep.mubr.msk.bf16.mxu0 %vm1786_vm0, %v1785_v1 }
  0x99   :  { %1342 = vmatmul.mubr.msk.bf16.gmra.mxu0 %vm178_vm1, %v1454_v25 }
  0xc9   :  { %v270_v27 = vpop.f32.mrf.mxu0 }
  0xca   :  { %v271_v28 = vadd.f32 %v1963_v26, %v270_v27 }
  0xcb   :  { %v1271_v29 = vpop.f32.mrf.mxu0 }
  0xcc   :  { %v421_v30 = vsub.f32 0.0, %v271_v28 }
  0xcd   :  { %v273_v31 = vpop.f32.mrf.mxu0 }
  0xce   :  { %v459_v32 = vmul.f32 1.442695, %v421_v30  ;;  %v274_v33 = vadd.f32 %v1963_v26, %v273_v31 }
  0xcf   :  { %v1272_v34 = vpop.f32.mrf.mxu0 }
  0xd0   :  { %1459 = vpow2.f32 %v459_v32  ;;  %v422_v35 = vsub.f32 0.0, %v274_v33 }
  0xd1   :  { %v278_v36 = vpop.f32.mrf.mxu0 }
  0xd2   :  { %v461_v37 = vmul.f32 1.442695, %v422_v35  ;;  %v279_v38 = vadd.f32 %v1963_v26, %v278_v36 }
  0xd3   :  { %v1275_v39 = vpop.f32.mrf.mxu0 }
  0xd4   :  { %1461 = vpow2.f32 %v461_v37  ;;  %v423_v40 = vsub.f32 0.0, %v279_v38 }
  0xd5   :  { %v281_v41 = vpop.f32.mrf.mxu0 }
  0xd6   :  { %v463_v42 = vmul.f32 1.442695, %v423_v40  ;;  %v282_v43 = vadd.f32 %v1963_v26, %v281_v41 }
  0xd7   :  { %v1276_v44 = vpop.f32.mrf.mxu0 }
  0xd8   :  { %1463 = vpow2.f32 %v463_v42  ;;  %v424_v45 = vsub.f32 0.0, %v282_v43 }
  0xd9   :  { %v286_v46 = vpop.f32.mrf.mxu0 }
  0xda   :  { %v465_v47 = vmul.f32 1.442695, %v424_v45  ;;  %v287_v48 = vadd.f32 %v1963_v26, %v286_v46 }
  0xdb   :  { %v1279_v49 = vpop.f32.mrf.mxu0 }
  0xdc   :  { %1465 = vpow2.f32 %v465_v47  ;;  %v425_v50 = vsub.f32 0.0, %v287_v48 }
  0xdd   :  { %v1460_v51 = vpop.eup %1459  ;;  %v289_v52 = vpop.f32.mrf.mxu0 }
  0xde   :  { %v467_v53 = vmul.f32 1.442695, %v425_v50  ;;  %v290_v54 = vadd.f32 %v1963_v26, %v289_v52  ;;  %v535_v55 = vadd.f32 1.0, %v1460_v51 }
  0xdf   :  { %v1280_v56 = vpop.f32.mrf.mxu0 }
  0xe0   :  { %v426_v57 = vsub.f32 0.0, %v290_v54  ;;  %1467 = vpow2.f32 %v467_v53 }
  0xe1   :  { %v1462_v58 = vpop.eup %1461  ;;  %v294_v59 = vpop.f32.mrf.mxu0  ;;  %1469 = vrcp.f32 %v535_v55 }
  0xe2   :  { %v536_v60 = vadd.f32 1.0, %v1462_v58  ;;  %v469_v61 = vmul.f32 1.442695, %v426_v57  ;;  %v295_v62 = vadd.f32 %v1963_v26, %v294_v59 }
  0xe3   :  { %v1283_v63 = vpop.f32.mrf.mxu0 }
  0xe4   :  { %1471 = vrcp.f32 %v536_v60  ;;  %v427_v0 = vsub.f32 0.0, %v295_v62 }
  0xe5   :  { %v1464_v2 = vpop.eup %1463  ;;  %1473 = vpow2.f32 %v469_v61  ;;  %v297_v3 = vpop.f32.mrf.mxu0 }
  0xe6   :  { %v471_v4 = vmul.f32 1.442695, %v427_v0  ;;  %v298_v5 = vadd.f32 %v1963_v26, %v297_v3  ;;  %v537_v6 = vadd.f32 1.0, %v1464_v2 }
  0xe7   :  { %v1284_v7 = vpop.f32.mrf.mxu0 }
  0xe8   :  { %v428_v8 = vsub.f32 0.0, %v298_v5  ;;  %1475 = vpow2.f32 %v471_v4 }
  0xe9   :  { %v1466_v9 = vpop.eup %1465  ;;  %v302_v10 = vpop.f32.mrf.mxu0  ;;  %1477 = vrcp.f32 %v537_v6 }
  0xea   :  { %v538_v11 = vadd.f32 1.0, %v1466_v9  ;;  %v473_v12 = vmul.f32 1.442695, %v428_v8  ;;  %v303_v13 = vadd.f32 %v1963_v26, %v302_v10 }
  0xeb   :  { %v1287_v14 = vpop.f32.mrf.mxu0 }
  0xec   :  { %1479 = vrcp.f32 %v538_v11  ;;  %v429_v15 = vsub.f32 0.0, %v303_v13 }
  0xed   :  { %1481 = vpow2.f32 %v473_v12  ;;  %v305_v16 = vpop.f32.mrf.mxu0  ;;  %v1468_v17 = vpop.eup %1467 }
  0xee   :  { %v475_v18 = vmul.f32 1.442695, %v429_v15  ;;  %v306_v19 = vadd.f32 %v1963_v26, %v305_v16  ;;  %v539_v20 = vadd.f32 1.0, %v1468_v17  ;;  %v1470_v22 = vpop.eup %1469 }
  0xef   :  { %v1288_v21 = vpop.f32.mrf.mxu0 }
  0xf0   :  { %1483 = vpow2.f32 %v475_v18  ;;  %v430_v23 = vsub.f32 0.0, %v306_v19 }
  0xf1   :  { %v1472_v24 = vpop.eup %1471  ;;  %v310_v25 = vpop.f32.mrf.mxu0  ;;  %1485 = vrcp.f32 %v539_v20 }
  0xf2   :  { %v1474_v27 = vpop.eup %1473  ;;  %v477_v28 = vmul.f32 1.442695, %v430_v23  ;;  %v311_v29 = vadd.f32 %v1963_v26, %v310_v25  ;;  %v611_v30 = vpack.c.bf16 %v1472_v24, %v1470_v22 }
  0xf3   :  { %v540_v31 = vadd.f32 1.0, %v1474_v27  ;;  %v1291_v32 = vpop.f32.mrf.mxu0 }
  0xf4   :  { %1487 = vpow2.f32 %v477_v28  ;;  %v431_v33 = vsub.f32 0.0, %v311_v29  ;;  %1354 = vmatmul.mubr.msk.bf16.vlgmr.msra.gmra.mxu1 %vm669_vm2, %v611_v30 }
  0xf5   :  { %1489 = vrcp.f32 %v540_v31  ;;  %v313_v34 = vpop.f32.mrf.mxu0  ;;  %1357 = vmatprep.mubr.msk.bf16.mxu1 %vm1786_vm0, %v1785_v1  ;;  %v1476_v35 = vpop.eup %1475 }
  0xf6   :  { %v479_v36 = vmul.f32 1.442695, %v431_v33  ;;  %v314_v37 = vadd.f32 %v1963_v26, %v313_v34  ;;  %v541_v38 = vadd.f32 1.0, %v1476_v35  ;;  %v1478_v40 = vpop.eup %1477 }
  0xf7   :  { %v1292_v39 = vpop.f32.mrf.mxu0 }
  0xf8   :  { %1491 = vpow2.f32 %v479_v36  ;;  %v432_v41 = vsub.f32 0.0, %v314_v37 }
  0xf9   :  { %v1480_v42 = vpop.eup %1479  ;;  %v318_v43 = vpop.f32.mrf.mxu0  ;;  %1493 = vrcp.f32 %v541_v38 }
  0xfa   :  { %v1482_v44 = vpop.eup %1481  ;;  %v481_v45 = vmul.f32 1.442695, %v432_v41  ;;  %v319_v46 = vadd.f32 %v1963_v26, %v318_v43  ;;  %v612_v47 = vpack.c.bf16 %v1480_v42, %v1478_v40 }
  0xfb   :  { %v542_v48 = vadd.f32 1.0, %v1482_v44  ;;  %v1295_v49 = vpop.f32.mrf.mxu0 }
  0xfc   :  { %1495 = vpow2.f32 %v481_v45  ;;  %v433_v50 = vsub.f32 0.0, %v319_v46  ;;  %1358 = vmatmul.mubr.msk.bf16.gmra.mxu1 %vm669_vm2, %v612_v47 }
  0xfd   :  { %v1484_v51 = vpop.eup %1483  ;;  %1497 = vrcp.f32 %v542_v48  ;;  %v321_v52 = vpop.f32.mrf.mxu0  ;;  %1361 = vmatprep.mubr.msk.bf16.mxu1 %vm1786_vm0, %v1785_v1 }
  0xfe   :  { %v483_v53 = vmul.f32 1.442695, %v433_v50  ;;  %v322_v54 = vadd.f32 %v1963_v26, %v321_v52  ;;  %v543_v55 = vadd.f32 1.0, %v1484_v51  ;;  %v1486_v57 = vpop.eup %1485 }
  0xff   :  { %v1296_v56 = vpop.f32.mrf.mxu0 }
 0x100   :  { %v434_v58 = vsub.f32 0.0, %v322_v54  ;;  %1499 = vpow2.f32 %v483_v53 }
 0x101   :  { %v1488_v59 = vpop.eup %1487  ;;  %v326_v60 = vpop.f32.mrf.mxu0  ;;  %1501 = vrcp.f32 %v543_v55 }
 0x102   :  { %v1490_v61 = vpop.eup %1489  ;;  %v544_v62 = vadd.f32 1.0, %v1488_v59  ;;  %v485_v63 = vmul.f32 1.442695, %v434_v58  ;;  %v327_v0 = vadd.f32 %v1963_v26, %v326_v60 }
 0x103   :  { %v1299_v2 = vpop.f32.mrf.mxu0  ;;  %v613_v3 = vpack.c.bf16 %v1490_v61, %v1486_v57 }
 0x104   :  { %1503 = vrcp.f32 %v544_v62  ;;  %v435_v4 = vsub.f32 0.0, %v327_v0 }
 0x105   :  { %v1492_v5 = vpop.eup %1491  ;;  %1505 = vpow2.f32 %v485_v63  ;;  %1362 = vmatmul.mubr.msk.bf16.gmra.mxu1 %vm669_vm2, %v613_v3  ;;  %v329_v6 = vpop.f32.mrf.mxu0 }
 0x106   :  { %v487_v7 = vmul.f32 1.442695, %v435_v4  ;;  %v330_v8 = vadd.f32 %v1963_v26, %v329_v6  ;;  %1365 = vmatprep.mubr.msk.bf16.mxu1 %vm1786_vm0, %v1785_v1  ;;  %v545_v9 = vadd.f32 1.0, %v1492_v5  ;;  %v1494_v11 = vpop.eup %1493 }
 0x107   :  { %v1300_v10 = vpop.f32.mrf.mxu0 }
 0x108   :  { %v436_v12 = vsub.f32 0.0, %v330_v8  ;;  %1507 = vpow2.f32 %v487_v7 }
 0x109   :  { %v1496_v13 = vpop.eup %1495  ;;  %v334_v14 = vpop.f32.mrf.mxu0  ;;  %1509 = vrcp.f32 %v545_v9 }
 0x10a   :  { %v1498_v15 = vpop.eup %1497  ;;  %v546_v16 = vadd.f32 1.0, %v1496_v13  ;;  %v489_v17 = vmul.f32 1.442695, %v436_v12  ;;  %v335_v18 = vadd.f32 %v1963_v26, %v334_v14 }
 0x10b   :  { %v1303_v19 = vpop.f32.mrf.mxu0  ;;  %v614_v20 = vpack.c.bf16 %v1498_v15, %v1494_v11 }
 0x10c   :  { %1511 = vrcp.f32 %v546_v16  ;;  %v437_v21 = vsub.f32 0.0, %v335_v18 }
 0x10d   :  { %1513 = vpow2.f32 %v489_v17  ;;  %1366 = vmatmul.mubr.msk.bf16.gmra.mxu1 %vm669_vm2, %v614_v20  ;;  %v337_v22 = vpop.f32.mrf.mxu0  ;;  %v1500_v23 = vpop.eup %1499 }
 0x10e   :  { %v491_v24 = vmul.f32 1.442695, %v437_v21  ;;  %v338_v25 = vadd.f32 %v1963_v26, %v337_v22  ;;  %1369 = vmatprep.mubr.msk.bf16.mxu1 %vm1786_vm0, %v1785_v1  ;;  %v547_v27 = vadd.f32 1.0, %v1500_v23  ;;  %v1502_v29 = vpop.eup %1501 }
 0x10f   :  { %v1304_v28 = vpop.f32.mrf.mxu0 }
 0x110   :  { %1515 = vpow2.f32 %v491_v24  ;;  %v438_v30 = vsub.f32 0.0, %v338_v25 }
 0x111   :  { %v1504_v31 = vpop.eup %1503  ;;  %v342_v32 = vpop.f32.mrf.mxu0  ;;  %1517 = vrcp.f32 %v547_v27 }
 0x112   :  { %v1506_v33 = vpop.eup %1505  ;;  %v493_v34 = vmul.f32 1.442695, %v438_v30  ;;  %v343_v35 = vadd.f32 %v1963_v26, %v342_v32  ;;  %v615_v36 = vpack.c.bf16 %v1504_v31, %v1502_v29 }
 0x113   :  { %v548_v37 = vadd.f32 1.0, %v1506_v33  ;;  %v1307_v38 = vpop.f32.mrf.mxu0 }
 0x114   :  { %1519 = vpow2.f32 %v493_v34  ;;  %v439_v39 = vsub.f32 0.0, %v343_v35 }
 0x115   :  { %1521 = vrcp.f32 %v548_v37  ;;  %1370 = vmatmul.mubr.msk.bf16.gmra.mxu1 %vm669_vm2, %v615_v36  ;;  %v345_v40 = vpop.f32.mrf.mxu0  ;;  %v1508_v41 = vpop.eup %1507 }
 0x116   :  { %v495_v42 = vmul.f32 1.442695, %v439_v39  ;;  %v346_v43 = vadd.f32 %v1963_v26, %v345_v40  ;;  %1373 = vmatprep.mubr.msk.bf16.mxu1 %vm1786_vm0, %v1785_v1  ;;  %v549_v44 = vadd.f32 1.0, %v1508_v41  ;;  %v1510_v46 = vpop.eup %1509 }
 0x117   :  { %v1308_v45 = vpop.f32.mrf.mxu0 }
 0x118   :  { %1523 = vpow2.f32 %v495_v42  ;;  %v440_v47 = vsub.f32 0.0, %v346_v43 }
 0x119   :  { %v1512_v48 = vpop.eup %1511  ;;  %v350_v49 = vpop.f32.mrf.mxu0  ;;  %1525 = vrcp.f32 %v549_v44 }
 0x11a   :  { %v1514_v50 = vpop.eup %1513  ;;  %v497_v51 = vmul.f32 1.442695, %v440_v47  ;;  %v351_v52 = vadd.f32 %v1963_v26, %v350_v49  ;;  %v616_v53 = vpack.c.bf16 %v1512_v48, %v1510_v46 }
 0x11b   :  { %v550_v54 = vadd.f32 1.0, %v1514_v50  ;;  %v1311_v55 = vpop.f32.mrf.mxu0 }
 0x11c   :  { %1527 = vpow2.f32 %v497_v51  ;;  %v441_v56 = vsub.f32 0.0, %v351_v52 }
 0x11d   :  { %v1516_v57 = vpop.eup %1515  ;;  %1529 = vrcp.f32 %v550_v54  ;;  %1374 = vmatmul.mubr.msk.bf16.gmra.mxu1 %vm669_vm2, %v616_v53  ;;  %v353_v58 = vpop.f32.mrf.mxu0 }
 0x11e   :  { %v499_v59 = vmul.f32 1.442695, %v441_v56  ;;  %v354_v60 = vadd.f32 %v1963_v26, %v353_v58  ;;  %1377 = vmatprep.mubr.msk.bf16.mxu1 %vm1786_vm0, %v1785_v1  ;;  %v551_v61 = vadd.f32 1.0, %v1516_v57  ;;  %v1518_v63 = vpop.eup %1517 }
 0x11f   :  { %v1312_v62 = vpop.f32.mrf.mxu0 }
 0x120   :  { %v442_v0 = vsub.f32 0.0, %v354_v60  ;;  %1531 = vpow2.f32 %v499_v59 }
 0x121   :  { %v1520_v2 = vpop.eup %1519  ;;  %v358_v3 = vpop.f32.mrf.mxu0  ;;  %1533 = vrcp.f32 %v551_v61 }
 0x122   :  { %v1522_v4 = vpop.eup %1521  ;;  %v552_v5 = vadd.f32 1.0, %v1520_v2  ;;  %v501_v6 = vmul.f32 1.442695, %v442_v0  ;;  %v359_v7 = vadd.f32 %v1963_v26, %v358_v3 }
 0x123   :  { %v1315_v8 = vpop.f32.mrf.mxu0  ;;  %v617_v9 = vpack.c.bf16 %v1522_v4, %v1518_v63 }
 0x124   :  { %1535 = vrcp.f32 %v552_v5  ;;  %v443_v10 = vsub.f32 0.0, %v359_v7 }
 0x125   :  { %v1524_v11 = vpop.eup %1523  ;;  %1537 = vpow2.f32 %v501_v6  ;;  %1378 = vmatmul.mubr.msk.bf16.gmra.mxu1 %vm669_vm2, %v617_v9  ;;  %v361_v12 = vpop.f32.mrf.mxu0 }
 0x126   :  { %v503_v13 = vmul.f32 1.442695, %v443_v10  ;;  %v362_v14 = vadd.f32 %v1963_v26, %v361_v12  ;;  %1381 = vmatprep.mubr.msk.bf16.mxu1 %vm1786_vm0, %v1785_v1  ;;  %v553_v15 = vadd.f32 1.0, %v1524_v11  ;;  %v1526_v17 = vpop.eup %1525 }
 0x127   :  { %v1316_v16 = vpop.f32.mrf.mxu0 }
 0x128   :  { %v444_v18 = vsub.f32 0.0, %v362_v14  ;;  %1539 = vpow2.f32 %v503_v13 }
 0x129   :  { %v1528_v19 = vpop.eup %1527  ;;  %v366_v20 = vpop.f32.mrf.mxu0  ;;  %1541 = vrcp.f32 %v553_v15 }
 0x12a   :  { %v1530_v21 = vpop.eup %1529  ;;  %v554_v22 = vadd.f32 1.0, %v1528_v19  ;;  %v505_v23 = vmul.f32 1.442695, %v444_v18  ;;  %v367_v24 = vadd.f32 %v1963_v26, %v366_v20 }
 0x12b   :  { %v1319_v25 = vpop.f32.mrf.mxu0  ;;  %v618_v27 = vpack.c.bf16 %v1530_v21, %v1526_v17 }
 0x12c   :  { %1543 = vrcp.f32 %v554_v22  ;;  %v445_v28 = vsub.f32 0.0, %v367_v24 }
 0x12d   :  { %1545 = vpow2.f32 %v505_v23  ;;  %1382 = vmatmul.mubr.msk.bf16.gmra.mxu1 %vm669_vm2, %v618_v27  ;;  %v369_v29 = vpop.f32.mrf.mxu0  ;;  %v1532_v30 = vpop.eup %1531 }
 0x12e   :  { %v507_v31 = vmul.f32 1.442695, %v445_v28  ;;  %v370_v32 = vadd.f32 %v1963_v26, %v369_v29  ;;  %1385 = vmatprep.mubr.msk.bf16.mxu1 %vm1786_vm0, %v1785_v1  ;;  %v555_v33 = vadd.f32 1.0, %v1532_v30  ;;  %v1534_v35 = vpop.eup %1533 }
 0x12f   :  { %v1320_v34 = vpop.f32.mrf.mxu0 }
 0x130   :  { %1547 = vpow2.f32 %v507_v31  ;;  %v446_v36 = vsub.f32 0.0, %v370_v32 }
 0x131   :  { %v1536_v37 = vpop.eup %1535  ;;  %v374_v38 = vpop.f32.mrf.mxu0  ;;  %1549 = vrcp.f32 %v555_v33 }
 0x132   :  { %v1538_v39 = vpop.eup %1537  ;;  %v509_v40 = vmul.f32 1.442695, %v446_v36  ;;  %v375_v41 = vadd.f32 %v1963_v26, %v374_v38  ;;  %v619_v42 = vpack.c.bf16 %v1536_v37, %v1534_v35 }
 0x133   :  { %v556_v43 = vadd.f32 1.0, %v1538_v39  ;;  %v1323_v44 = vpop.f32.mrf.mxu0 }
 0x134   :  { %1551 = vpow2.f32 %v509_v40  ;;  %v447_v45 = vsub.f32 0.0, %v375_v41 }
 0x135   :  { %1553 = vrcp.f32 %v556_v43  ;;  %1386 = vmatmul.mubr.msk.bf16.gmra.mxu1 %vm669_vm2, %v619_v42  ;;  %v377_v46 = vpop.f32.mrf.mxu0  ;;  %v1540_v47 = vpop.eup %1539 }
 0x136   :  { %v511_v48 = vmul.f32 1.442695, %v447_v45  ;;  %v378_v49 = vadd.f32 %v1963_v26, %v377_v46  ;;  %1389 = vmatprep.mubr.msk.bf16.mxu1 %vm1786_vm0, %v1785_v1  ;;  %v557_v50 = vadd.f32 1.0, %v1540_v47  ;;  %v1542_v52 = vpop.eup %1541 }
 0x137   :  { %v1324_v51 = vpop.f32.mrf.mxu0 }
 0x138   :  { %1555 = vpow2.f32 %v511_v48  ;;  %v448_v53 = vsub.f32 0.0, %v378_v49 }
 0x139   :  { %v1544_v54 = vpop.eup %1543  ;;  %v382_v55 = vpop.f32.mrf.mxu0  ;;  %1557 = vrcp.f32 %v557_v50 }
 0x13a   :  { %v1546_v56 = vpop.eup %1545  ;;  %v513_v57 = vmul.f32 1.442695, %v448_v53  ;;  %v383_v58 = vadd.f32 %v1963_v26, %v382_v55  ;;  %v620_v59 = vpack.c.bf16 %v1544_v54, %v1542_v52 }
 0x13b   :  { %v558_v60 = vadd.f32 1.0, %v1546_v56  ;;  %v1327_v61 = vpop.f32.mrf.mxu0 }
 0x13c   :  { %1559 = vpow2.f32 %v513_v57  ;;  %v449_v62 = vsub.f32 0.0, %v383_v58 }
 0x13d   :  { %v1548_v63 = vpop.eup %1547  ;;  %1561 = vrcp.f32 %v558_v60  ;;  %1390 = vmatmul.mubr.msk.bf16.gmra.mxu1 %vm669_vm2, %v620_v59  ;;  %v385_v0 = vpop.f32.mrf.mxu0 }
 0x13e   :  { %v515_v2 = vmul.f32 1.442695, %v449_v62  ;;  %v386_v3 = vadd.f32 %v1963_v26, %v385_v0  ;;  %1393 = vmatprep.mubr.msk.bf16.mxu1 %vm1786_vm0, %v1785_v1  ;;  %v559_v4 = vadd.f32 1.0, %v1548_v63  ;;  %v1550_v6 = vpop.eup %1549 }
 0x13f   :  { %v1328_v5 = vpop.f32.mrf.mxu0 }
 0x140   :  { %v450_v7 = vsub.f32 0.0, %v386_v3  ;;  %1563 = vpow2.f32 %v515_v2 }
 0x141   :  { %v1552_v8 = vpop.eup %1551  ;;  %v390_v9 = vpop.f32.mrf.mxu0  ;;  %1565 = vrcp.f32 %v559_v4 }
 0x142   :  { %v1554_v10 = vpop.eup %1553  ;;  %v560_v11 = vadd.f32 1.0, %v1552_v8  ;;  %v517_v12 = vmul.f32 1.442695, %v450_v7  ;;  %v391_v13 = vadd.f32 %v1963_v26, %v390_v9 }
 0x143   :  { %v1331_v14 = vpop.f32.mrf.mxu0  ;;  %v621_v15 = vpack.c.bf16 %v1554_v10, %v1550_v6 }
 0x144   :  { %1567 = vrcp.f32 %v560_v11  ;;  %v451_v16 = vsub.f32 0.0, %v391_v13 }
 0x145   :  { %v1556_v17 = vpop.eup %1555  ;;  %1569 = vpow2.f32 %v517_v12  ;;  %1394 = vmatmul.mubr.msk.bf16.gmra.mxu1 %vm669_vm2, %v621_v15  ;;  %v393_v18 = vpop.f32.mrf.mxu0 }
 0x146   :  { %v519_v19 = vmul.f32 1.442695, %v451_v16  ;;  %v394_v20 = vadd.f32 %v1963_v26, %v393_v18  ;;  %1397 = vmatprep.mubr.msk.bf16.mxu1 %vm1786_vm0, %v1785_v1  ;;  %v561_v21 = vadd.f32 1.0, %v1556_v17  ;;  %v1558_v23 = vpop.eup %1557 }
 0x147   :  { %v1332_v22 = vpop.f32.mrf.mxu0 }
 0x148   :  { %v452_v24 = vsub.f32 0.0, %v394_v20  ;;  %1571 = vpow2.f32 %v519_v19 }
 0x149   :  { %v1560_v25 = vpop.eup %1559  ;;  %v398_v27 = vpop.f32.mrf.mxu0  ;;  %1573 = vrcp.f32 %v561_v21 }
 0x14a   :  { %v1562_v28 = vpop.eup %1561  ;;  %v562_v29 = vadd.f32 1.0, %v1560_v25  ;;  %v521_v30 = vmul.f32 1.442695, %v452_v24  ;;  %v399_v31 = vadd.f32 %v1963_v26, %v398_v27 }
 0x14b   :  { %v1335_v32 = vpop.f32.mrf.mxu0  ;;  %v622_v33 = vpack.c.bf16 %v1562_v28, %v1558_v23 }
 0x14c   :  { %1575 = vrcp.f32 %v562_v29  ;;  %v453_v34 = vsub.f32 0.0, %v399_v31 }
 0x14d   :  { %1577 = vpow2.f32 %v521_v30  ;;  %1398 = vmatmul.mubr.msk.bf16.gmra.mxu1 %vm669_vm2, %v622_v33  ;;  %v401_v35 = vpop.f32.mrf.mxu0  ;;  %v1564_v36 = vpop.eup %1563 }
 0x14e   :  { %v523_v37 = vmul.f32 1.442695, %v453_v34  ;;  %v402_v38 = vadd.f32 %v1963_v26, %v401_v35  ;;  %1401 = vmatprep.mubr.msk.bf16.mxu1 %vm1786_vm0, %v1785_v1  ;;  %v563_v39 = vadd.f32 1.0, %v1564_v36  ;;  %v1566_v41 = vpop.eup %1565 }
 0x14f   :  { %v1336_v40 = vpop.f32.mrf.mxu0 }
 0x150   :  { %1579 = vpow2.f32 %v523_v37  ;;  %v454_v42 = vsub.f32 0.0, %v402_v38 }
 0x151   :  { %v1568_v43 = vpop.eup %1567  ;;  %v406_v44 = vpop.f32.mrf.mxu0  ;;  %1581 = vrcp.f32 %v563_v39  ;;  %v2061_v39 = vld [vmem:[%s2108_s4] ss:$0 sm:$0xff]  ;;  %s1787_s4 = smov [#allocation2]  }
 0x152   :  { %v1570_v45 = vpop.eup %1569  ;;  %v525_v46 = vmul.f32 1.442695, %v454_v42  ;;  %v407_v47 = vadd.f32 %v1963_v26, %v406_v44  ;;  %v623_v48 = vpack.c.bf16 %v1568_v43, %v1566_v41  ;;  %s1145_s17 = sshll.u32 %s1787_s4, 4  ;;  %s1146_s17 = int_to_ptr.vmem [resolvable:$true] %s1145_s17 }
 0x153   :  { %v564_v49 = vadd.f32 1.0, %v1570_v45  ;;  %v1339_v50 = vpop.f32.mrf.mxu0  ;;  %s1763_s18 = scalar_lea.vmem %s1146_s17, 4864  ;;  %p1768_p1 = scmp.lt.s32.totalorder %s1146_s17, %s1146_s17 }
 0x154   :  { %1583 = vpow2.f32 %v525_v46  ;;  %v455_v51 = vsub.f32 0.0, %v407_v47  ;;  %p1764_p0 = scmp.ne.s32.totalorder %s1146_s17, %s1763_s18  ;;  %p1769_p2 = scmp.lt.s32.totalorder %s1763_s18, %s1763_s18 }
 0x155   :  { %1585 = vrcp.f32 %v564_v49  ;;  %1402 = vmatmul.mubr.msk.bf16.gmra.mxu1 %vm669_vm2, %v623_v48  ;;  %v409_v52 = vpop.f32.mrf.mxu0  ;;  %v1572_v53 = vpop.eup %1571 }
 0x156   :  { %v527_v54 = vmul.f32 1.442695, %v455_v51  ;;  %v410_v55 = vadd.f32 %v1963_v26, %v409_v52  ;;  %1405 = vmatprep.mubr.msk.bf16.mxu1 %vm1786_vm0, %v1785_v1  ;;  %v565_v56 = vadd.f32 1.0, %v1572_v53  ;;  %v1574_v58 = vpop.eup %1573  ;;  %p1770_p3 = por %p1769_p2, %p1768_p1 }
 0x157   :  { %v1340_v57 = vpop.f32.mrf.mxu0 }
 0x158   :  { %1587 = vpow2.f32 %v527_v54  ;;  %v456_v59 = vsub.f32 0.0, %v410_v55  ;;  %p1771_p4 = pnand %p1770_p3, %p1764_p0 }
 0x159   :  { %v1576_v60 = vpop.eup %1575  ;;  %v414_v61 = vpop.f32.mrf.mxu0  ;;  %1589 = vrcp.f32 %v565_v56 }
 0x15a   :  { %v1578_v62 = vpop.eup %1577  ;;  %v529_v63 = vmul.f32 1.442695, %v456_v59  ;;  %v415_v0 = vadd.f32 %v1963_v26, %v414_v61  ;;  %v624_v2 = vpack.c.bf16 %v1576_v60, %v1574_v58 }
 0x15b   :  { %v566_v3 = vadd.f32 1.0, %v1578_v62  ;;  %v1343_v4 = vpop.f32.mrf.mxu0 }
 0x15c   :  { %1591 = vpow2.f32 %v529_v63  ;;  %v457_v5 = vsub.f32 0.0, %v415_v0 }
 0x15d   :  { %v1580_v6 = vpop.eup %1579  ;;  %1593 = vrcp.f32 %v566_v3  ;;  %1406 = vmatmul.mubr.msk.bf16.gmra.mxu1 %vm669_vm2, %v624_v2  ;;  %v417_v7 = vpop.f32.mrf.mxu0 }
 0x15e   :  { %v531_v8 = vmul.f32 1.442695, %v457_v5  ;;  %v418_v9 = vadd.f32 %v1963_v26, %v417_v7  ;;  %1409 = vmatprep.mubr.msk.bf16.mxu1 %vm1786_vm0, %v1785_v1  ;;  %v567_v10 = vadd.f32 1.0, %v1580_v6  ;;  %v1582_v12 = vpop.eup %1581 }
 0x15f   :  { %v1344_v11 = vpop.f32.mrf.mxu0 }
 0x160   :  { %v458_v13 = vsub.f32 0.0, %v418_v9  ;;  %1595 = vpow2.f32 %v531_v8 }
 0x161   :  { %v1584_v14 = vpop.eup %1583  ;;  %1597 = vrcp.f32 %v567_v10 }
 0x162   :  { %v1586_v15 = vpop.eup %1585  ;;  %v568_v16 = vadd.f32 1.0, %v1584_v14  ;;  %v533_v17 = vmul.f32 1.442695, %v458_v13 }
 0x163   :  { %v625_v18 = vpack.c.bf16 %v1586_v15, %v1582_v12 }
 0x164   :  { %1599 = vrcp.f32 %v568_v16 }
 0x165   :  { %v1588_v19 = vpop.eup %1587  ;;  %1601 = vpow2.f32 %v533_v17  ;;  %1410 = vmatmul.mubr.msk.bf16.gmra.mxu1 %vm669_vm2, %v625_v18 }
 0x166   :  { %1413 = vmatprep.mubr.msk.bf16.mxu1 %vm1786_vm0, %v1785_v1  ;;  %v569_v26 = vadd.f32 1.0, %v1588_v19  ;;  %v1590_v20 = vpop.eup %1589 }
 0x168   :  { %1603 = vrcp.f32 %v569_v26 }
 0x169   :  { %v1592_v21 = vpop.eup %1591 }
 0x16a   :  { %v1594_v22 = vpop.eup %1593  ;;  %v570_v23 = vadd.f32 1.0, %v1592_v21 }
 0x16b   :  { %v626_v24 = vpack.c.bf16 %v1594_v22, %v1590_v20 }
 0x16c   :  { %1605 = vrcp.f32 %v570_v23 }
 0x16d   :  { %1414 = vmatmul.mubr.msk.bf16.gmra.mxu1 %vm669_vm2, %v626_v24  ;;  %v1596_v25 = vpop.eup %1595 }
 0x16e   :  { %1417 = vmatprep.mubr.msk.bf16.mxu1 %vm1786_vm0, %v1785_v1  ;;  %v1598_v27 = vpop.eup %1597  ;;  %v571_v28 = vadd.f32 1.0, %v1596_v25 }
 0x170   :  { %1607 = vrcp.f32 %v571_v28 }
 0x171   :  { %v1600_v29 = vpop.eup %1599 }
 0x172   :  { %v1602_v30 = vpop.eup %1601  ;;  %v627_v31 = vpack.c.bf16 %v1600_v29, %v1598_v27 }
 0x173   :  { %v572_v32 = vadd.f32 1.0, %v1602_v30 }
 0x175   :  { %1609 = vrcp.f32 %v572_v32  ;;  %1418 = vmatmul.mubr.msk.bf16.gmra.mxu1 %vm669_vm2, %v627_v31  ;;  %v1604_v33 = vpop.eup %1603 }
 0x176   :  { %1421 = vmatprep.mubr.msk.bf16.mxu1 %vm1786_vm0, %v1785_v1 }
 0x179   :  { %v1606_v34 = vpop.eup %1605 }
 0x17a   :  { %v628_v35 = vpack.c.bf16 %v1606_v34, %v1604_v33 }
 0x17d   :  { %1422 = vmatmul.mubr.msk.bf16.gmra.mxu1 %vm669_vm2, %v628_v35  ;;  %v1608_v36 = vpop.eup %1607 }
 0x17e   :  { %1425 = vmatprep.mubr.msk.bf16.mxu1 %vm1786_vm0, %v1785_v1 }
 0x182   :  { %v1610_v37 = vpop.eup %1609 }
 0x183   :  { %v629_v38 = vpack.c.bf16 %v1610_v37, %v1608_v36 }
 0x185   :  { %1426 = vmatmul.mubr.msk.bf16.gmra.mxu1 %vm669_vm2, %v629_v38 }
 0x1b4   :  { %v761_v40 = vpop.f32.mrf.mxu1 }
 0x1b5   :  { %v762_v41 = vadd.f32 %v2061_v39, %v761_v40 }
 0x1b6   :  { %v1355_v42 = vpop.f32.mrf.mxu1 }
 0x1b7   :  { %v912_v43 = vsub.f32 0.0, %v762_v41 }
 0x1b8   :  { %v764_v44 = vpop.f32.mrf.mxu1 }
 0x1b9   :  { %v950_v45 = vmul.f32 1.442695, %v912_v43  ;;  %v765_v46 = vadd.f32 %v2061_v39, %v764_v44 }
 0x1ba   :  { %v1356_v1 = vpop.f32.mrf.mxu1 }
 0x1bb   :  { %1611 = vpow2.f32 %v950_v45  ;;  %v913_v47 = vsub.f32 0.0, %v765_v46 }
 0x1bc   :  { %v769_v48 = vpop.f32.mrf.mxu1 }
 0x1bd   :  { %v952_v49 = vmul.f32 1.442695, %v913_v47  ;;  %v770_v50 = vadd.f32 %v2061_v39, %v769_v48 }
 0x1be   :  { %v1359_v51 = vpop.f32.mrf.mxu1 }
 0x1bf   :  { %1613 = vpow2.f32 %v952_v49  ;;  %v914_v52 = vsub.f32 0.0, %v770_v50 }
 0x1c0   :  { %v772_v53 = vpop.f32.mrf.mxu1 }
 0x1c1   :  { %v954_v54 = vmul.f32 1.442695, %v914_v52  ;;  %v773_v55 = vadd.f32 %v2061_v39, %v772_v53 }
 0x1c2   :  { %v1360_v56 = vpop.f32.mrf.mxu1 }
 0x1c3   :  { %1615 = vpow2.f32 %v954_v54  ;;  %v915_v57 = vsub.f32 0.0, %v773_v55 }
 0x1c5   :  { %v956_v58 = vmul.f32 1.442695, %v915_v57  ;;  %v777_v59 = vpop.f32.mrf.mxu1 }
 0x1c6   :  { %v778_v60 = vadd.f32 %v2061_v39, %v777_v59 }
 0x1c7   :  { %1617 = vpow2.f32 %v956_v58  ;;  %v1363_v61 = vpop.f32.mrf.mxu1 }
 0x1c8   :  { %v1612_v62 = vpop.eup %1611  ;;  %v916_v63 = vsub.f32 0.0, %v778_v60 }
 0x1c9   :  { %v1026_v0 = vadd.f32 1.0, %v1612_v62  ;;  %v780_v2 = vpop.f32.mrf.mxu1 }
 0x1ca   :  { %v958_v3 = vmul.f32 1.442695, %v916_v63  ;;  %v781_v4 = vadd.f32 %v2061_v39, %v780_v2 }
 0x1cb   :  { %1619 = vrcp.f32 %v1026_v0  ;;  %v1364_v5 = vpop.f32.mrf.mxu1 }
 0x1cc   :  { %v1614_v6 = vpop.eup %1613  ;;  %1621 = vpow2.f32 %v958_v3  ;;  %v917_v7 = vsub.f32 0.0, %v781_v4 }
 0x1cd   :  { %v1027_v8 = vadd.f32 1.0, %v1614_v6  ;;  %v785_v9 = vpop.f32.mrf.mxu1 }
 0x1ce   :  { %v960_v10 = vmul.f32 1.442695, %v917_v7  ;;  %v786_v11 = vadd.f32 %v2061_v39, %v785_v9 }
 0x1cf   :  { %1623 = vrcp.f32 %v1027_v8  ;;  %v1367_v12 = vpop.f32.mrf.mxu1 }
 0x1d0   :  { %v1616_v13 = vpop.eup %1615  ;;  %1625 = vpow2.f32 %v960_v10  ;;  %v918_v14 = vsub.f32 0.0, %v786_v11 }
 0x1d1   :  { %v1028_v15 = vadd.f32 1.0, %v1616_v13  ;;  %v788_v16 = vpop.f32.mrf.mxu1 }
 0x1d2   :  { %v962_v17 = vmul.f32 1.442695, %v918_v14  ;;  %v789_v18 = vadd.f32 %v2061_v39, %v788_v16 }
 0x1d3   :  { %1627 = vrcp.f32 %v1028_v15  ;;  %v1368_v19 = vpop.f32.mrf.mxu1 }
 0x1d4   :  { %v1618_v26 = vpop.eup %1617  ;;  %1629 = vpow2.f32 %v962_v17  ;;  %v919_v20 = vsub.f32 0.0, %v789_v18 }
 0x1d5   :  { %v1029_v21 = vadd.f32 1.0, %v1618_v26  ;;  %v793_v22 = vpop.f32.mrf.mxu1 }
 0x1d6   :  { %v964_v23 = vmul.f32 1.442695, %v919_v20  ;;  %v794_v24 = vadd.f32 %v2061_v39, %v793_v22 }
 0x1d7   :  { %1631 = vrcp.f32 %v1029_v21  ;;  %v1371_v25 = vpop.f32.mrf.mxu1 }
 0x1d8   :  { %v1620_v27 = vpop.eup %1619  ;;  %1633 = vpow2.f32 %v964_v23  ;;  %v920_v28 = vsub.f32 0.0, %v794_v24 }
 0x1d9   :  { %v1622_v29 = vpop.eup %1621  ;;  %1102 = vst [vmem:[#allocation2] sm:$0xff] %v1620_v27  ;;  %v796_v30 = vpop.f32.mrf.mxu1 }
 0x1da   :  { %v1030_v31 = vadd.f32 1.0, %v1622_v29  ;;  %v966_v32 = vmul.f32 1.442695, %v920_v28  ;;  %v797_v33 = vadd.f32 %v2061_v39, %v796_v30 }
 0x1db   :  { %v1372_v34 = vpop.f32.mrf.mxu1 }
 0x1dc   :  { %v1624_v35 = vpop.eup %1623  ;;  %1635 = vrcp.f32 %v1030_v31  ;;  %v921_v36 = vsub.f32 0.0, %v797_v33 }
 0x1dd   :  { %v1626_v37 = vpop.eup %1625  ;;  %1103 = vst [vmem:[#allocation2 + $0x8] sm:$0xff] %v1624_v35  ;;  %1637 = vpow2.f32 %v966_v32  ;;  %v801_v38 = vpop.f32.mrf.mxu1 }
 0x1de   :  { %v1031_v40 = vadd.f32 1.0, %v1626_v37  ;;  %v968_v41 = vmul.f32 1.442695, %v921_v36  ;;  %v802_v42 = vadd.f32 %v2061_v39, %v801_v38 }
 0x1df   :  { %v1375_v43 = vpop.f32.mrf.mxu1 }
 0x1e0   :  { %v1628_v44 = vpop.eup %1627  ;;  %1639 = vrcp.f32 %v1031_v40  ;;  %v922_v45 = vsub.f32 0.0, %v802_v42 }
 0x1e1   :  { %v1630_v46 = vpop.eup %1629  ;;  %1104 = vst [vmem:[#allocation2 + $0x10] sm:$0xff] %v1628_v44  ;;  %1641 = vpow2.f32 %v968_v41  ;;  %v804_v1 = vpop.f32.mrf.mxu1 }
 0x1e2   :  { %v1032_v47 = vadd.f32 1.0, %v1630_v46  ;;  %v970_v48 = vmul.f32 1.442695, %v922_v45  ;;  %v805_v49 = vadd.f32 %v2061_v39, %v804_v1 }
 0x1e3   :  { %v1376_v50 = vpop.f32.mrf.mxu1 }
 0x1e4   :  { %v1632_v51 = vpop.eup %1631  ;;  %1643 = vrcp.f32 %v1032_v47  ;;  %v923_v52 = vsub.f32 0.0, %v805_v49 }
 0x1e5   :  { %v1634_v53 = vpop.eup %1633  ;;  %1105 = vst [vmem:[#allocation2 + $0x18] sm:$0xff] %v1632_v51  ;;  %1645 = vpow2.f32 %v970_v48  ;;  %v809_v54 = vpop.f32.mrf.mxu1 }
 0x1e6   :  { %v1033_v55 = vadd.f32 1.0, %v1634_v53  ;;  %v972_v56 = vmul.f32 1.442695, %v923_v52  ;;  %v810_v57 = vadd.f32 %v2061_v39, %v809_v54 }
 0x1e7   :  { %v1379_v58 = vpop.f32.mrf.mxu1 }
 0x1e8   :  { %1647 = vrcp.f32 %v1033_v55  ;;  %v924_v59 = vsub.f32 0.0, %v810_v57 }
 0x1e9   :  { %v1636_v60 = vpop.eup %1635  ;;  %1649 = vpow2.f32 %v972_v56  ;;  %v812_v61 = vpop.f32.mrf.mxu1 }
 0x1ea   :  { %v1638_v62 = vpop.eup %1637  ;;  %1106 = vst [vmem:[#allocation2 + $0x20] sm:$0xff] %v1636_v60  ;;  %v974_v63 = vmul.f32 1.442695, %v924_v59  ;;  %v813_v0 = vadd.f32 %v2061_v39, %v812_v61 }
 0x1eb   :  { %v1034_v2 = vadd.f32 1.0, %v1638_v62  ;;  %v1380_v3 = vpop.f32.mrf.mxu1 }
 0x1ec   :  { %1651 = vpow2.f32 %v974_v63  ;;  %v925_v4 = vsub.f32 0.0, %v813_v0 }
 0x1ed   :  { %v1640_v5 = vpop.eup %1639  ;;  %1653 = vrcp.f32 %v1034_v2  ;;  %v817_v6 = vpop.f32.mrf.mxu1 }
 0x1ee   :  { %v1642_v7 = vpop.eup %1641  ;;  %1107 = vst [vmem:[#allocation2 + $0x28] sm:$0xff] %v1640_v5  ;;  %v976_v8 = vmul.f32 1.442695, %v925_v4  ;;  %v818_v9 = vadd.f32 %v2061_v39, %v817_v6 }
 0x1ef   :  { %v1035_v10 = vadd.f32 1.0, %v1642_v7  ;;  %v1383_v11 = vpop.f32.mrf.mxu1 }
 0x1f0   :  { %1655 = vpow2.f32 %v976_v8  ;;  %v926_v12 = vsub.f32 0.0, %v818_v9 }
 0x1f1   :  { %v1644_v13 = vpop.eup %1643  ;;  %1657 = vrcp.f32 %v1035_v10  ;;  %v820_v14 = vpop.f32.mrf.mxu1 }
 0x1f2   :  { %v1646_v15 = vpop.eup %1645  ;;  %1108 = vst [vmem:[#allocation2 + $0x30] sm:$0xff] %v1644_v13  ;;  %v978_v16 = vmul.f32 1.442695, %v926_v12  ;;  %v821_v17 = vadd.f32 %v2061_v39, %v820_v14 }
 0x1f3   :  { %v1036_v18 = vadd.f32 1.0, %v1646_v15  ;;  %v1384_v19 = vpop.f32.mrf.mxu1 }
 0x1f4   :  { %1659 = vpow2.f32 %v978_v16  ;;  %v927_v26 = vsub.f32 0.0, %v821_v17 }
 0x1f5   :  { %v1648_v20 = vpop.eup %1647  ;;  %1661 = vrcp.f32 %v1036_v18  ;;  %v825_v21 = vpop.f32.mrf.mxu1 }
 0x1f6   :  { %v1650_v22 = vpop.eup %1649  ;;  %1109 = vst [vmem:[#allocation2 + $0x38] sm:$0xff] %v1648_v20  ;;  %v980_v23 = vmul.f32 1.442695, %v927_v26  ;;  %v826_v24 = vadd.f32 %v2061_v39, %v825_v21 }
 0x1f7   :  { %v1037_v25 = vadd.f32 1.0, %v1650_v22  ;;  %v1387_v27 = vpop.f32.mrf.mxu1 }
 0x1f8   :  { %1663 = vpow2.f32 %v980_v23  ;;  %v928_v28 = vsub.f32 0.0, %v826_v24 }
 0x1f9   :  { %v1652_v29 = vpop.eup %1651  ;;  %1665 = vrcp.f32 %v1037_v25  ;;  %v828_v30 = vpop.f32.mrf.mxu1 }
 0x1fa   :  { %v1654_v31 = vpop.eup %1653  ;;  %v1038_v32 = vadd.f32 1.0, %v1652_v29  ;;  %v982_v33 = vmul.f32 1.442695, %v928_v28  ;;  %v829_v34 = vadd.f32 %v2061_v39, %v828_v30 }
 0x1fb   :  { %1110 = vst [vmem:[#allocation2 + $0x40] sm:$0xff] %v1654_v31  ;;  %v1388_v35 = vpop.f32.mrf.mxu1 }
 0x1fc   :  { %1667 = vrcp.f32 %v1038_v32  ;;  %v929_v36 = vsub.f32 0.0, %v829_v34 }
 0x1fd   :  { %v1656_v37 = vpop.eup %1655  ;;  %1669 = vpow2.f32 %v982_v33  ;;  %v833_v38 = vpop.f32.mrf.mxu1 }
 0x1fe   :  { %v1658_v40 = vpop.eup %1657  ;;  %v1039_v41 = vadd.f32 1.0, %v1656_v37  ;;  %v984_v42 = vmul.f32 1.442695, %v929_v36  ;;  %v834_v43 = vadd.f32 %v2061_v39, %v833_v38 }
 0x1ff   :  { %1111 = vst [vmem:[#allocation2 + $0x48] sm:$0xff] %v1658_v40  ;;  %v1391_v44 = vpop.f32.mrf.mxu1 }
 0x200   :  { %1671 = vrcp.f32 %v1039_v41  ;;  %v930_v45 = vsub.f32 0.0, %v834_v43 }
 0x201   :  { %v1660_v46 = vpop.eup %1659  ;;  %1673 = vpow2.f32 %v984_v42  ;;  %v836_v1 = vpop.f32.mrf.mxu1 }
 0x202   :  { %v1662_v47 = vpop.eup %1661  ;;  %v1040_v48 = vadd.f32 1.0, %v1660_v46  ;;  %v986_v49 = vmul.f32 1.442695, %v930_v45  ;;  %v837_v50 = vadd.f32 %v2061_v39, %v836_v1 }
 0x203   :  { %1112 = vst [vmem:[#allocation2 + $0x50] sm:$0xff] %v1662_v47  ;;  %v1392_v51 = vpop.f32.mrf.mxu1 }
 0x204   :  { %1675 = vrcp.f32 %v1040_v48  ;;  %v931_v52 = vsub.f32 0.0, %v837_v50 }
 0x205   :  { %v1664_v53 = vpop.eup %1663  ;;  %1677 = vpow2.f32 %v986_v49  ;;  %v841_v54 = vpop.f32.mrf.mxu1 }
 0x206   :  { %v1666_v55 = vpop.eup %1665  ;;  %v1041_v56 = vadd.f32 1.0, %v1664_v53  ;;  %v988_v57 = vmul.f32 1.442695, %v931_v52  ;;  %v842_v58 = vadd.f32 %v2061_v39, %v841_v54 }
 0x207   :  { %1113 = vst [vmem:[#allocation2 + $0x58] sm:$0xff] %v1666_v55  ;;  %v1395_v59 = vpop.f32.mrf.mxu1 }
 0x208   :  { %1679 = vrcp.f32 %v1041_v56  ;;  %v932_v60 = vsub.f32 0.0, %v842_v58 }
 0x209   :  { %v1668_v61 = vpop.eup %1667  ;;  %1681 = vpow2.f32 %v988_v57  ;;  %v844_v62 = vpop.f32.mrf.mxu1 }
 0x20a   :  { %v1670_v63 = vpop.eup %1669  ;;  %1114 = vst [vmem:[#allocation2 + $0x60] sm:$0xff] %v1668_v61  ;;  %v990_v0 = vmul.f32 1.442695, %v932_v60  ;;  %v845_v2 = vadd.f32 %v2061_v39, %v844_v62 }
 0x20b   :  { %v1042_v3 = vadd.f32 1.0, %v1670_v63  ;;  %v1396_v4 = vpop.f32.mrf.mxu1 }
 0x20c   :  { %1683 = vpow2.f32 %v990_v0  ;;  %v933_v5 = vsub.f32 0.0, %v845_v2 }
 0x20d   :  { %v1672_v6 = vpop.eup %1671  ;;  %1685 = vrcp.f32 %v1042_v3  ;;  %v849_v7 = vpop.f32.mrf.mxu1 }
 0x20e   :  { %v1674_v8 = vpop.eup %1673  ;;  %1115 = vst [vmem:[#allocation2 + $0x68] sm:$0xff] %v1672_v6  ;;  %v992_v9 = vmul.f32 1.442695, %v933_v5  ;;  %v850_v10 = vadd.f32 %v2061_v39, %v849_v7 }
 0x20f   :  { %v1043_v11 = vadd.f32 1.0, %v1674_v8  ;;  %v1399_v12 = vpop.f32.mrf.mxu1 }
 0x210   :  { %1687 = vpow2.f32 %v992_v9  ;;  %v934_v13 = vsub.f32 0.0, %v850_v10 }
 0x211   :  { %v1676_v14 = vpop.eup %1675  ;;  %1689 = vrcp.f32 %v1043_v11  ;;  %v852_v15 = vpop.f32.mrf.mxu1 }
 0x212   :  { %v1678_v16 = vpop.eup %1677  ;;  %1116 = vst [vmem:[#allocation2 + $0x70] sm:$0xff] %v1676_v14  ;;  %v994_v17 = vmul.f32 1.442695, %v934_v13  ;;  %v853_v18 = vadd.f32 %v2061_v39, %v852_v15 }
 0x213   :  { %v1044_v19 = vadd.f32 1.0, %v1678_v16  ;;  %v1400_v26 = vpop.f32.mrf.mxu1 }
 0x214   :  { %1691 = vpow2.f32 %v994_v17  ;;  %v935_v20 = vsub.f32 0.0, %v853_v18 }
 0x215   :  { %v1680_v21 = vpop.eup %1679  ;;  %1693 = vrcp.f32 %v1044_v19  ;;  %v857_v22 = vpop.f32.mrf.mxu1 }
 0x216   :  { %v1682_v23 = vpop.eup %1681  ;;  %1117 = vst [vmem:[#allocation2 + $0x78] sm:$0xff] %v1680_v21  ;;  %v996_v24 = vmul.f32 1.442695, %v935_v20  ;;  %v858_v25 = vadd.f32 %v2061_v39, %v857_v22 }
 0x217   :  { %v1045_v27 = vadd.f32 1.0, %v1682_v23  ;;  %v1403_v28 = vpop.f32.mrf.mxu1 }
 0x218   :  { %1695 = vpow2.f32 %v996_v24  ;;  %v936_v29 = vsub.f32 0.0, %v858_v25 }
 0x219   :  { %v1684_v30 = vpop.eup %1683  ;;  %1697 = vrcp.f32 %v1045_v27  ;;  %v860_v31 = vpop.f32.mrf.mxu1 }
 0x21a   :  { %v1686_v32 = vpop.eup %1685  ;;  %v1046_v33 = vadd.f32 1.0, %v1684_v30  ;;  %v998_v34 = vmul.f32 1.442695, %v936_v29  ;;  %v861_v35 = vadd.f32 %v2061_v39, %v860_v31 }
 0x21b   :  { %1118 = vst [vmem:[#allocation2 + $0x80] sm:$0xff] %v1686_v32  ;;  %v1404_v36 = vpop.f32.mrf.mxu1 }
 0x21c   :  { %1699 = vrcp.f32 %v1046_v33  ;;  %v937_v37 = vsub.f32 0.0, %v861_v35 }
 0x21d   :  { %v1688_v38 = vpop.eup %1687  ;;  %1701 = vpow2.f32 %v998_v34  ;;  %v865_v40 = vpop.f32.mrf.mxu1 }
 0x21e   :  { %v1690_v41 = vpop.eup %1689  ;;  %v1047_v42 = vadd.f32 1.0, %v1688_v38  ;;  %v1000_v43 = vmul.f32 1.442695, %v937_v37  ;;  %v866_v44 = vadd.f32 %v2061_v39, %v865_v40 }
 0x21f   :  { %1119 = vst [vmem:[#allocation2 + $0x88] sm:$0xff] %v1690_v41  ;;  %v1407_v45 = vpop.f32.mrf.mxu1 }
 0x220   :  { %1703 = vrcp.f32 %v1047_v42  ;;  %v938_v46 = vsub.f32 0.0, %v866_v44 }
 0x221   :  { %v1692_v1 = vpop.eup %1691  ;;  %1705 = vpow2.f32 %v1000_v43  ;;  %v868_v47 = vpop.f32.mrf.mxu1 }
 0x222   :  { %v1694_v48 = vpop.eup %1693  ;;  %v1048_v49 = vadd.f32 1.0, %v1692_v1  ;;  %v1002_v50 = vmul.f32 1.442695, %v938_v46  ;;  %v869_v51 = vadd.f32 %v2061_v39, %v868_v47 }
 0x223   :  { %1120 = vst [vmem:[#allocation2 + $0x90] sm:$0xff] %v1694_v48  ;;  %v1408_v52 = vpop.f32.mrf.mxu1 }
 0x224   :  { %1707 = vrcp.f32 %v1048_v49  ;;  %v939_v53 = vsub.f32 0.0, %v869_v51 }
 0x225   :  { %v1696_v54 = vpop.eup %1695  ;;  %1709 = vpow2.f32 %v1002_v50  ;;  %v873_v55 = vpop.f32.mrf.mxu1 }
 0x226   :  { %v1698_v56 = vpop.eup %1697  ;;  %v1049_v57 = vadd.f32 1.0, %v1696_v54  ;;  %v1004_v58 = vmul.f32 1.442695, %v939_v53  ;;  %v874_v59 = vadd.f32 %v2061_v39, %v873_v55 }
 0x227   :  { %1121 = vst [vmem:[#allocation2 + $0x98] sm:$0xff] %v1698_v56  ;;  %v1411_v60 = vpop.f32.mrf.mxu1 }
 0x228   :  { %1711 = vrcp.f32 %v1049_v57  ;;  %v940_v61 = vsub.f32 0.0, %v874_v59 }
 0x229   :  { %v1700_v62 = vpop.eup %1699  ;;  %1713 = vpow2.f32 %v1004_v58  ;;  %v876_v63 = vpop.f32.mrf.mxu1 }
 0x22a   :  { %v1702_v0 = vpop.eup %1701  ;;  %1122 = vst [vmem:[#allocation2 + $0xa0] sm:$0xff] %v1700_v62  ;;  %v1006_v2 = vmul.f32 1.442695, %v940_v61  ;;  %v877_v3 = vadd.f32 %v2061_v39, %v876_v63 }
 0x22b   :  { %v1050_v4 = vadd.f32 1.0, %v1702_v0  ;;  %v1412_v5 = vpop.f32.mrf.mxu1 }
 0x22c   :  { %1715 = vpow2.f32 %v1006_v2  ;;  %v941_v6 = vsub.f32 0.0, %v877_v3 }
 0x22d   :  { %v1704_v7 = vpop.eup %1703  ;;  %1717 = vrcp.f32 %v1050_v4  ;;  %v881_v8 = vpop.f32.mrf.mxu1 }
 0x22e   :  { %v1706_v9 = vpop.eup %1705  ;;  %1123 = vst [vmem:[#allocation2 + $0xa8] sm:$0xff] %v1704_v7  ;;  %v1008_v10 = vmul.f32 1.442695, %v941_v6  ;;  %v882_v11 = vadd.f32 %v2061_v39, %v881_v8 }
 0x22f   :  { %v1051_v12 = vadd.f32 1.0, %v1706_v9  ;;  %v1415_v13 = vpop.f32.mrf.mxu1 }
 0x230   :  { %1719 = vpow2.f32 %v1008_v10  ;;  %v942_v14 = vsub.f32 0.0, %v882_v11 }
 0x231   :  { %v1708_v15 = vpop.eup %1707  ;;  %1721 = vrcp.f32 %v1051_v12  ;;  %v884_v16 = vpop.f32.mrf.mxu1 }
 0x232   :  { %v1710_v17 = vpop.eup %1709  ;;  %1124 = vst [vmem:[#allocation2 + $0xb0] sm:$0xff] %v1708_v15  ;;  %v1010_v18 = vmul.f32 1.442695, %v942_v14  ;;  %v885_v19 = vadd.f32 %v2061_v39, %v884_v16 }
 0x233   :  { %v1052_v26 = vadd.f32 1.0, %v1710_v17  ;;  %v1416_v20 = vpop.f32.mrf.mxu1 }
 0x234   :  { %1723 = vpow2.f32 %v1010_v18  ;;  %v943_v21 = vsub.f32 0.0, %v885_v19 }
 0x235   :  { %v1712_v22 = vpop.eup %1711  ;;  %1725 = vrcp.f32 %v1052_v26  ;;  %v889_v23 = vpop.f32.mrf.mxu1 }
 0x236   :  { %v1714_v24 = vpop.eup %1713  ;;  %1125 = vst [vmem:[#allocation2 + $0xb8] sm:$0xff] %v1712_v22  ;;  %v1012_v25 = vmul.f32 1.442695, %v943_v21  ;;  %v890_v27 = vadd.f32 %v2061_v39, %v889_v23 }
 0x237   :  { %v1053_v28 = vadd.f32 1.0, %v1714_v24  ;;  %v1419_v29 = vpop.f32.mrf.mxu1 }
 0x238   :  { %1727 = vpow2.f32 %v1012_v25  ;;  %v944_v30 = vsub.f32 0.0, %v890_v27 }
 0x239   :  { %v1716_v31 = vpop.eup %1715  ;;  %1729 = vrcp.f32 %v1053_v28  ;;  %v892_v32 = vpop.f32.mrf.mxu1 }
 0x23a   :  { %v1718_v33 = vpop.eup %1717  ;;  %v1054_v34 = vadd.f32 1.0, %v1716_v31  ;;  %v1014_v35 = vmul.f32 1.442695, %v944_v30  ;;  %v893_v36 = vadd.f32 %v2061_v39, %v892_v32 }
 0x23b   :  { %1126 = vst [vmem:[#allocation2 + $0xc0] sm:$0xff] %v1718_v33  ;;  %v1420_v37 = vpop.f32.mrf.mxu1 }
 0x23c   :  { %1731 = vrcp.f32 %v1054_v34  ;;  %v945_v38 = vsub.f32 0.0, %v893_v36 }
 0x23d   :  { %v1720_v40 = vpop.eup %1719  ;;  %1733 = vpow2.f32 %v1014_v35  ;;  %v897_v41 = vpop.f32.mrf.mxu1 }
 0x23e   :  { %v1722_v42 = vpop.eup %1721  ;;  %v1055_v43 = vadd.f32 1.0, %v1720_v40  ;;  %v1016_v44 = vmul.f32 1.442695, %v945_v38  ;;  %v898_v45 = vadd.f32 %v2061_v39, %v897_v41 }
 0x23f   :  { %1127 = vst [vmem:[#allocation2 + $0xc8] sm:$0xff] %v1722_v42  ;;  %v1423_v46 = vpop.f32.mrf.mxu1 }
 0x240   :  { %1735 = vrcp.f32 %v1055_v43  ;;  %v946_v1 = vsub.f32 0.0, %v898_v45 }
 0x241   :  { %v1724_v47 = vpop.eup %1723  ;;  %1737 = vpow2.f32 %v1016_v44  ;;  %v900_v48 = vpop.f32.mrf.mxu1 }
 0x242   :  { %v1726_v49 = vpop.eup %1725  ;;  %v1056_v50 = vadd.f32 1.0, %v1724_v47  ;;  %v1018_v51 = vmul.f32 1.442695, %v946_v1  ;;  %v901_v52 = vadd.f32 %v2061_v39, %v900_v48 }
 0x243   :  { %1128 = vst [vmem:[#allocation2 + $0xd0] sm:$0xff] %v1726_v49  ;;  %v1424_v53 = vpop.f32.mrf.mxu1 }
 0x244   :  { %1739 = vrcp.f32 %v1056_v50  ;;  %v947_v54 = vsub.f32 0.0, %v901_v52 }
 0x245   :  { %v1728_v55 = vpop.eup %1727  ;;  %1741 = vpow2.f32 %v1018_v51  ;;  %v905_v56 = vpop.f32.mrf.mxu1 }
 0x246   :  { %v1730_v57 = vpop.eup %1729  ;;  %v1057_v58 = vadd.f32 1.0, %v1728_v55  ;;  %v1020_v59 = vmul.f32 1.442695, %v947_v54  ;;  %v906_v60 = vadd.f32 %v2061_v39, %v905_v56 }
 0x247   :  { %1129 = vst [vmem:[#allocation2 + $0xd8] sm:$0xff] %v1730_v57  ;;  %v1427_v61 = vpop.f32.mrf.mxu1 }
 0x248   :  { %1743 = vrcp.f32 %v1057_v58  ;;  %v948_v62 = vsub.f32 0.0, %v906_v60 }
 0x249   :  { %v1732_v63 = vpop.eup %1731  ;;  %1745 = vpow2.f32 %v1020_v59  ;;  %v908_v0 = vpop.f32.mrf.mxu1 }
 0x24a   :  { %v1734_v2 = vpop.eup %1733  ;;  %1130 = vst [vmem:[#allocation2 + $0xe0] sm:$0xff] %v1732_v63  ;;  %v1022_v3 = vmul.f32 1.442695, %v948_v62  ;;  %v909_v4 = vadd.f32 %v2061_v39, %v908_v0 }
 0x24b   :  { %v1058_v5 = vadd.f32 1.0, %v1734_v2  ;;  %v1428_v6 = vpop.f32.mrf.mxu1 }
 0x24c   :  { %1747 = vpow2.f32 %v1022_v3  ;;  %v949_v7 = vsub.f32 0.0, %v909_v4 }
 0x24d   :  { %v1736_v8 = vpop.eup %1735  ;;  %1749 = vrcp.f32 %v1058_v5 }
 0x24e   :  { %v1738_v9 = vpop.eup %1737  ;;  %1131 = vst [vmem:[#allocation2 + $0xe8] sm:$0xff] %v1736_v8  ;;  %v1024_v10 = vmul.f32 1.442695, %v949_v7 }
 0x24f   :  { %v1059_v11 = vadd.f32 1.0, %v1738_v9 }
 0x250   :  { %1751 = vpow2.f32 %v1024_v10 }
 0x251   :  { %v1740_v12 = vpop.eup %1739  ;;  %1753 = vrcp.f32 %v1059_v11 }
 0x252   :  { %v1742_v13 = vpop.eup %1741  ;;  %1132 = vst [vmem:[#allocation2 + $0xf0] sm:$0xff] %v1740_v12 }
 0x253   :  { %v1060_v14 = vadd.f32 1.0, %v1742_v13 }
 0x255   :  { %v1744_v15 = vpop.eup %1743  ;;  %1755 = vrcp.f32 %v1060_v14 }
 0x256   :  { %v1746_v16 = vpop.eup %1745  ;;  %1133 = vst [vmem:[#allocation2 + $0xf8] sm:$0xff] %v1744_v15 }
 0x257   :  { %v1061_v39 = vadd.f32 1.0, %v1746_v16 }
 0x259   :  { %v1748_v17 = vpop.eup %1747  ;;  %1757 = vrcp.f32 %v1061_v39 }
 0x25a   :  { %v1750_v18 = vpop.eup %1749  ;;  %v1062_v19 = vadd.f32 1.0, %v1748_v17 }
 0x25b   :  { %1134 = vst [vmem:[#allocation2 + $0x100] sm:$0xff] %v1750_v18 }
 0x25c   :  { %1759 = vrcp.f32 %v1062_v19 }
 0x25d   :  { %v1752_v26 = vpop.eup %1751 }
 0x25e   :  { %v1754_v20 = vpop.eup %1753  ;;  %v1063_v21 = vadd.f32 1.0, %v1752_v26 }
 0x25f   :  { %1135 = vst [vmem:[#allocation2 + $0x108] sm:$0xff] %v1754_v20 }
 0x260   :  { %1761 = vrcp.f32 %v1063_v21 }
 0x262   :  { %v1756_v22 = vpop.eup %1755 }
 0x263   :  { %1136 = vst [vmem:[#allocation2 + $0x110] sm:$0xff] %v1756_v22 }
 0x266   :  { %v1758_v23 = vpop.eup %1757 }
 0x267   :  { %1137 = vst [vmem:[#allocation2 + $0x118] sm:$0xff] %v1758_v23 }
 0x269   :  { %v1760_v24 = vpop.eup %1759 }
 0x26a   :  { %1138 = vst [vmem:[#allocation2 + $0x120] sm:$0xff] %v1760_v24 }
 0x26d   :  { %v1762_v25 = vpop.eup %1761 }
 0x26e   :  { %1139 = vst [vmem:[#allocation2 + $0x128] sm:$0xff] %v1762_v25 }
 0x26f   :  { %1774 = shalt.err (!%p1771_p4)
}
 0x270   :  { %s1788_s19 = smov 128   ;;  %s1789_s20 = smov 8  }
 0x271   :  { %1151 = dma.vmem_to_hbm [thread:$0]  %s1146_s17, 4864, %s2109_s5, [#allocation3], %s1788_s19, %s1788_s19, %s1789_s20  }
 0x272   :  { %1783 = dma.done.wait [#allocation3], 4864  }
 0x273   :  { %1784 = vsyncadd [#allocation3], 4294962432 }
 0x274   :  { %1155 = vsyncpa [#allocation3], 1 }

</bundles_post_ra>
